<compile_context>
chip_gen: v7x
topology: tpu7x:2x2x1
jax: 0.10.0
libtpu: 0.0.40
codegen_flags: <defaults>
</compile_context>

<pallas_src>
import jax
import jax.numpy as jnp
from jax import lax
from jax.experimental import pallas as pl
from jax.experimental.pallas import tpu as pltpu


def decoder_kernel(x_ref,
                   w1_ref, b1_ref,
                   w2_ref, b2_ref,
                   w3_ref, b3_ref,
                   w4_ref, b4_ref,
                   w5_ref, b5_ref,
                   wf_ref, bf_ref,
                   o_ref):
    """Fused 5x (Linear -> ReLU) -> Linear(H, 1), transposed compute layout.

    x_ref  : (TM, D_in)  bf16  natural row-major tile of x
    wK_ref : (H, D_in|H) bf16  PyTorch (out, in) layout; LHS of each matmul
    bK_ref : (H, 1)      f32   broadcast along lanes
    wf_ref : (H, 1) f32, bf_ref : (1, 1) f32
    o_ref  : (1, TM)     f32   lane-dense output tile
    """
    f32 = jnp.float32
    bf16 = jnp.bfloat16

    # Layer 1: contract D_in of both operands -> (H, TM).  This reorients x to
    # the (feature, rows) layout inside the kernel (no wrapper transpose pass).
    h = lax.dot_general(w1_ref[...], x_ref[...],
                        dimension_numbers=(((1,), (1,)), ((), ())),
                        preferred_element_type=f32)
    h = jnp.maximum(h + b1_ref[...], 0.0)

    h = jnp.dot(w2_ref[...], h.astype(bf16), preferred_element_type=f32)
    h = jnp.maximum(h + b2_ref[...], 0.0)

    h = jnp.dot(w3_ref[...], h.astype(bf16), preferred_element_type=f32)
    h = jnp.maximum(h + b3_ref[...], 0.0)

    h = jnp.dot(w4_ref[...], h.astype(bf16), preferred_element_type=f32)
    h = jnp.maximum(h + b4_ref[...], 0.0)

    h = jnp.dot(w5_ref[...], h.astype(bf16), preferred_element_type=f32)
    h = jnp.maximum(h + b5_ref[...], 0.0)

    # Final fc(H -> 1): VPU multiply + cross-sublane reduce -> (1, TM),
    # keeping the store lane-dense instead of a degenerate N=1 MXU matmul.
    o_ref[...] = jnp.sum(h * wf_ref[...], axis=0, keepdims=True) + bf_ref[...]


def _cdiv(a: int, b: int) -> int:
    return -(-a // b)


def _round_up(n: int, m: int) -> int:
    return _cdiv(n, m) * m


def _resident_spec(shape):
    """Whole-array block, constant index map, single-buffered if supported."""
    index_map = lambda i: (0,) * len(shape)
    try:
        # Resident weights never re-DMA -> 1 buffer halves their VMEM footprint.
        return pl.BlockSpec(shape, index_map, pipeline_mode=pl.Buffered(1))
    except TypeError:
        # Fallback for API variants without the pipeline_mode kwarg.
        return pl.BlockSpec(shape, index_map)


def _choose_tiling(M: int, D_in: int, H: int, tm_max: int):
    """Balanced, lane-aligned row tiles bounded by a v7x-safe VMEM budget."""
    # Per-row VMEM that scales with TM:
    #   x double-buffer (bf16) + out double-buffer (f32) + ~3 live (H,) f32.
    per_row = 2 * D_in * 2 + 2 * 4 + 3 * H * 4
    budget = 40 * 1024 * 1024                     # headroom under 64 MiB/TC (v7x)
    tm_cap = max(128, (budget // per_row) // 128 * 128)
    tm_eff = max(128, min(tm_max, tm_cap))

    n_tiles = _cdiv(M, tm_eff)
    if M > 128 and n_tiles < 2:
        n_tiles = 2                               # let both v7x TensorCores work
    tm = _round_up(_cdiv(M, n_tiles), 128)        # balanced -> minimal row padding
    n_tiles = _cdiv(M, tm)
    return tm, n_tiles


def init_decoder_params(key, input_size: int, hidden_dim: int):
    """Deterministic synthetic weights in PyTorch nn.Linear layout (out, in)."""
    dims = [(hidden_dim, input_size)] + [(hidden_dim, hidden_dim)] * 4 \
           + [(1, hidden_dim)]
    params = []
    for (d_out, d_in) in dims:
        key, kw, kb = jax.random.split(key, 3)
        bound = 1.0 / (d_in ** 0.5)  # nn.Linear default U(-1/sqrt(in), 1/sqrt(in))
        w = jax.random.uniform(kw, (d_out, d_in), jnp.float32, -bound, bound)
        b = jax.random.uniform(kb, (d_out, 1), jnp.float32, -bound, bound)
        params.append((w, b))
    return params


def decoder_forward(x, params, *, tm_max: int = 2048):
    """x: (B, S, D_in) -> (B, S)  (matches the PyTorch forward + squeeze(-1))."""
    B, S, D_in = x.shape
    H = params[0][0].shape[0]
    M = B * S

    TM, num_tiles = _choose_tiling(M, D_in, H, tm_max)
    M_pad = num_tiles * TM

    # Natural row-major layout; pad rows, cast the dominant x stream to bf16.
    x2d = x.reshape(M, D_in)
    if M_pad != M:
        x2d = jnp.pad(x2d, ((0, M_pad - M), (0, 0)))
    x2d = x2d.astype(jnp.bfloat16)

    (w1, b1), (w2, b2), (w3, b3), (w4, b4), (w5, b5), (wf, bf) = params
    # MXU operands in bf16 (cast once here); biases and the fc head stay f32.
    ws = [w.astype(jnp.bfloat16) for w in (w1, w2, w3, w4, w5)]
    bs = [b.reshape(H, 1).astype(jnp.float32) for b in (b1, b2, b3, b4, b5)]
    wf_col = wf.reshape(H, 1).astype(jnp.float32)
    bf_sc = bf.reshape(1, 1).astype(jnp.float32)

    weights = [ws[0], bs[0], ws[1], bs[1], ws[2], bs[2],
               ws[3], bs[3], ws[4], bs[4], wf_col, bf_sc]

    # x tile streams over the grid (auto double-buffered); weights/biases are
    # whole-array, constant-index, single-buffered -> DMA'd once, VMEM-resident.
    in_specs = [pl.BlockSpec((TM, D_in), lambda i: (i, 0))] \
               + [_resident_spec(a.shape) for a in weights]
    out_specs = pl.BlockSpec((1, TM), lambda i: (0, i))

    # Derive the VMEM limit from actual sizes (v7x has only 64 MiB per TC).
    weight_bytes = sum(a.size * a.dtype.itemsize for a in weights)
    stream_bytes = 2 * TM * D_in * 2 + 2 * TM * 4      # x + out double buffers
    live_bytes = 3 * H * TM * 4                        # live f32 intermediates
    vmem_needed = 2 * weight_bytes + stream_bytes + live_bytes + (1 << 20)
    vmem_limit = int(min(max(vmem_needed, 32 * 1024 * 1024), 56 * 1024 * 1024))

    flops = 2 * M_pad * (D_in * H + 4 * H * H + H)
    bytes_accessed = (M_pad * D_in * 2 + M_pad * 4
                      + sum(a.size * a.dtype.itemsize for a in weights))

    out2d = pl.pallas_call(
        decoder_kernel,
        out_shape=jax.ShapeDtypeStruct((1, M_pad), jnp.float32),
        grid_spec=pltpu.PrefetchScalarGridSpec(
            num_scalar_prefetch=0,
            grid=(num_tiles,),
            in_specs=in_specs,
            out_specs=out_specs,
        ),
        compiler_params=pltpu.CompilerParams(
            dimension_semantics=("parallel",),   # v7x: the 2 TCs split row tiles
            vmem_limit_bytes=vmem_limit,
        ),
        cost_estimate=pl.CostEstimate(
            flops=flops, transcendentals=0, bytes_accessed=bytes_accessed),
    )(x2d, *weights)

    return out2d[0, :M].reshape(B, S)


# One jit over the whole wrapper so the reshape/pad/bf16 casts fuse with the
# surrounding graph instead of materializing extra HBM passes.
decoder_forward = jax.jit(decoder_forward, static_argnames=("tm_max",))


def decoder_ref(x, params):
    """Pure-JAX f32 reference for correctness checking (weights in (out, in))."""
    B, S, D_in = x.shape
    h = x.reshape(B * S, D_in).astype(jnp.float32)
    for i, (w, b) in enumerate(params):
        h = h @ w.T + b.T
        if i < len(params) - 1:
            h = jnp.maximum(h, 0.0)
    return h.reshape(B, S)


if __name__ == "__main__":
    key = jax.random.PRNGKey(0)
    kx, kp = jax.random.split(key)

    # Small shapes consistent with the module's forward:
    # x: (batch=2, seq=8, input_size=16), hidden_dim=32.
    B, S, D_in, H = 2, 8, 16, 32
    x = jax.random.normal(kx, (B, S, D_in), jnp.float32)
    params = init_decoder_params(kp, D_in, H)

    out = decoder_forward(x, params)
    out = jax.block_until_ready(out)

    ref = decoder_ref(x, params)
    assert out.shape == (B, S), out.shape
    # bf16 MXU operands with f32 accumulation vs. pure-f32 reference.
    assert jnp.allclose(out, ref, atol=5e-2, rtol=5e-2), "mismatch vs reference"

    print("KERNEL_OK")
</pallas_src>

<mosaic_0001>
module attributes {stable_mosaic.version = 11 : i64} {
  func.func @decoder_kernel(%arg0: i32, %arg1: memref<128x16xbf16, #tpu.memory_space<vmem>>, %arg2: memref<32x16xbf16, #tpu.memory_space<vmem>>, %arg3: memref<32x1xf32, #tpu.memory_space<vmem>>, %arg4: memref<32x32xbf16, #tpu.memory_space<vmem>>, %arg5: memref<32x1xf32, #tpu.memory_space<vmem>>, %arg6: memref<32x32xbf16, #tpu.memory_space<vmem>>, %arg7: memref<32x1xf32, #tpu.memory_space<vmem>>, %arg8: memref<32x32xbf16, #tpu.memory_space<vmem>>, %arg9: memref<32x1xf32, #tpu.memory_space<vmem>>, %arg10: memref<32x32xbf16, #tpu.memory_space<vmem>>, %arg11: memref<32x1xf32, #tpu.memory_space<vmem>>, %arg12: memref<32x1xf32, #tpu.memory_space<vmem>>, %arg13: memref<1x1xf32, #tpu.memory_space<vmem>>, %arg14: memref<1x128xf32, #tpu.memory_space<vmem>>) attributes {dimension_semantics = [#tpu.dimension_semantics<parallel>], iteration_bounds = array<i64: 1>, scalar_prefetch = 0 : i64, scratch_operands = 0 : i64, tpu.core_type = #tpu.core_type<tc>, window_params = [{transform_indices = @transform_0, window_bounds = array<i64: 128, 16>}, {pipeline_mode = #tpu.pipeline_mode<synchronous>, transform_indices = @transform_1, window_bounds = array<i64: 32, 16>}, {pipeline_mode = #tpu.pipeline_mode<synchronous>, transform_indices = @transform_2, window_bounds = array<i64: 32, 1>}, {pipeline_mode = #tpu.pipeline_mode<synchronous>, transform_indices = @transform_3, window_bounds = array<i64: 32, 32>}, {pipeline_mode = #tpu.pipeline_mode<synchronous>, transform_indices = @transform_4, window_bounds = array<i64: 32, 1>}, {pipeline_mode = #tpu.pipeline_mode<synchronous>, transform_indices = @transform_5, window_bounds = array<i64: 32, 32>}, {pipeline_mode = #tpu.pipeline_mode<synchronous>, transform_indices = @transform_6, window_bounds = array<i64: 32, 1>}, {pipeline_mode = #tpu.pipeline_mode<synchronous>, transform_indices = @transform_7, window_bounds = array<i64: 32, 32>}, {pipeline_mode = #tpu.pipeline_mode<synchronous>, transform_indices = @transform_8, window_bounds = array<i64: 32, 1>}, {pipeline_mode = #tpu.pipeline_mode<synchronous>, transform_indices = @transform_9, window_bounds = array<i64: 32, 32>}, {pipeline_mode = #tpu.pipeline_mode<synchronous>, transform_indices = @transform_10, window_bounds = array<i64: 32, 1>}, {pipeline_mode = #tpu.pipeline_mode<synchronous>, transform_indices = @transform_11, window_bounds = array<i64: 32, 1>}, {pipeline_mode = #tpu.pipeline_mode<synchronous>, transform_indices = @transform_12, window_bounds = array<i64: 1, 1>}, {transform_indices = @transform_13, window_bounds = array<i64: 1, 128>}]} {
    %c0 = arith.constant 0 : index
    %c0_0 = arith.constant 0 : index
    %0 = vector.load %arg2[%c0, %c0_0] : memref<32x16xbf16, #tpu.memory_space<vmem>>, vector<32x16xbf16>
    %c0_1 = arith.constant 0 : index
    %c0_2 = arith.constant 0 : index
    %1 = vector.load %arg1[%c0_1, %c0_2] : memref<128x16xbf16, #tpu.memory_space<vmem>>, vector<128x16xbf16>
    %cst = arith.constant dense<0.000000e+00> : vector<32x128xf32>
    %2 = tpu.matmul %0, %1, %cst {dimension_numbers = #tpu.dot_dimension_numbers<[1], [1], [0], [0], [0, 0, 1, 0], [], []>} : vector<32x16xbf16>, vector<128x16xbf16>, vector<32x128xf32> -> vector<32x128xf32>
    %c0_3 = arith.constant 0 : index
    %c0_4 = arith.constant 0 : index
    %3 = vector.load %arg3[%c0_3, %c0_4] : memref<32x1xf32, #tpu.memory_space<vmem>>, vector<32x1xf32>
    %4 = vector.broadcast %3 : vector<32x1xf32> to vector<32x128xf32>
    %5 = arith.addf %2, %4 : vector<32x128xf32>
    %cst_5 = arith.constant 0.000000e+00 : f32
    %6 = vector.broadcast %cst_5 : f32 to vector<32x128xf32>
    %7 = arith.maximumf %5, %6 : vector<32x128xf32>
    %c0_6 = arith.constant 0 : index
    %c0_7 = arith.constant 0 : index
    %8 = vector.load %arg4[%c0_6, %c0_7] : memref<32x32xbf16, #tpu.memory_space<vmem>>, vector<32x32xbf16>
    %9 = arith.truncf %7 : vector<32x128xf32> to vector<32x128xbf16>
    %cst_8 = arith.constant dense<0.000000e+00> : vector<32x128xf32>
    %10 = tpu.matmul %8, %9, %cst_8 {dimension_numbers = #tpu.dot_dimension_numbers<[1], [0], [0], [1], [0, 0, 1, 1], [], []>} : vector<32x32xbf16>, vector<32x128xbf16>, vector<32x128xf32> -> vector<32x128xf32>
    %c0_9 = arith.constant 0 : index
    %c0_10 = arith.constant 0 : index
    %11 = vector.load %arg5[%c0_9, %c0_10] : memref<32x1xf32, #tpu.memory_space<vmem>>, vector<32x1xf32>
    %12 = vector.broadcast %11 : vector<32x1xf32> to vector<32x128xf32>
    %13 = arith.addf %10, %12 : vector<32x128xf32>
    %cst_11 = arith.constant 0.000000e+00 : f32
    %14 = vector.broadcast %cst_11 : f32 to vector<32x128xf32>
    %15 = arith.maximumf %13, %14 : vector<32x128xf32>
    %c0_12 = arith.constant 0 : index
    %c0_13 = arith.constant 0 : index
    %16 = vector.load %arg6[%c0_12, %c0_13] : memref<32x32xbf16, #tpu.memory_space<vmem>>, vector<32x32xbf16>
    %17 = arith.truncf %15 : vector<32x128xf32> to vector<32x128xbf16>
    %cst_14 = arith.constant dense<0.000000e+00> : vector<32x128xf32>
    %18 = tpu.matmul %16, %17, %cst_14 {dimension_numbers = #tpu.dot_dimension_numbers<[1], [0], [0], [1], [0, 0, 1, 1], [], []>} : vector<32x32xbf16>, vector<32x128xbf16>, vector<32x128xf32> -> vector<32x128xf32>
    %c0_15 = arith.constant 0 : index
    %c0_16 = arith.constant 0 : index
    %19 = vector.load %arg7[%c0_15, %c0_16] : memref<32x1xf32, #tpu.memory_space<vmem>>, vector<32x1xf32>
    %20 = vector.broadcast %19 : vector<32x1xf32> to vector<32x128xf32>
    %21 = arith.addf %18, %20 : vector<32x128xf32>
    %cst_17 = arith.constant 0.000000e+00 : f32
    %22 = vector.broadcast %cst_17 : f32 to vector<32x128xf32>
    %23 = arith.maximumf %21, %22 : vector<32x128xf32>
    %c0_18 = arith.constant 0 : index
    %c0_19 = arith.constant 0 : index
    %24 = vector.load %arg8[%c0_18, %c0_19] : memref<32x32xbf16, #tpu.memory_space<vmem>>, vector<32x32xbf16>
    %25 = arith.truncf %23 : vector<32x128xf32> to vector<32x128xbf16>
    %cst_20 = arith.constant dense<0.000000e+00> : vector<32x128xf32>
    %26 = tpu.matmul %24, %25, %cst_20 {dimension_numbers = #tpu.dot_dimension_numbers<[1], [0], [0], [1], [0, 0, 1, 1], [], []>} : vector<32x32xbf16>, vector<32x128xbf16>, vector<32x128xf32> -> vector<32x128xf32>
    %c0_21 = arith.constant 0 : index
    %c0_22 = arith.constant 0 : index
    %27 = vector.load %arg9[%c0_21, %c0_22] : memref<32x1xf32, #tpu.memory_space<vmem>>, vector<32x1xf32>
    %28 = vector.broadcast %27 : vector<32x1xf32> to vector<32x128xf32>
    %29 = arith.addf %26, %28 : vector<32x128xf32>
    %cst_23 = arith.constant 0.000000e+00 : f32
    %30 = vector.broadcast %cst_23 : f32 to vector<32x128xf32>
    %31 = arith.maximumf %29, %30 : vector<32x128xf32>
    %c0_24 = arith.constant 0 : index
    %c0_25 = arith.constant 0 : index
    %32 = vector.load %arg10[%c0_24, %c0_25] : memref<32x32xbf16, #tpu.memory_space<vmem>>, vector<32x32xbf16>
    %33 = arith.truncf %31 : vector<32x128xf32> to vector<32x128xbf16>
    %cst_26 = arith.constant dense<0.000000e+00> : vector<32x128xf32>
    %34 = tpu.matmul %32, %33, %cst_26 {dimension_numbers = #tpu.dot_dimension_numbers<[1], [0], [0], [1], [0, 0, 1, 1], [], []>} : vector<32x32xbf16>, vector<32x128xbf16>, vector<32x128xf32> -> vector<32x128xf32>
    %c0_27 = arith.constant 0 : index
    %c0_28 = arith.constant 0 : index
    %35 = vector.load %arg11[%c0_27, %c0_28] : memref<32x1xf32, #tpu.memory_space<vmem>>, vector<32x1xf32>
    %36 = vector.broadcast %35 : vector<32x1xf32> to vector<32x128xf32>
    %37 = arith.addf %34, %36 : vector<32x128xf32>
    %cst_29 = arith.constant 0.000000e+00 : f32
    %38 = vector.broadcast %cst_29 : f32 to vector<32x128xf32>
    %39 = arith.maximumf %37, %38 : vector<32x128xf32>
    %c0_30 = arith.constant 0 : index
    %c0_31 = arith.constant 0 : index
    %40 = vector.load %arg12[%c0_30, %c0_31] : memref<32x1xf32, #tpu.memory_space<vmem>>, vector<32x1xf32>
    %41 = vector.broadcast %40 : vector<32x1xf32> to vector<32x128xf32>
    %42 = arith.mulf %39, %41 : vector<32x128xf32>
    %cst_32 = arith.constant dense<0.000000e+00> : vector<128xf32>
    %43 = vector.multi_reduction <add>, %42, %cst_32 [0] : vector<32x128xf32> to vector<128xf32>
    %44 = vector.shape_cast %43 : vector<128xf32> to vector<1x128xf32>
    %c0_33 = arith.constant 0 : index
    %c0_34 = arith.constant 0 : index
    %45 = vector.load %arg13[%c0_33, %c0_34] : memref<1x1xf32, #tpu.memory_space<vmem>>, vector<1x1xf32>
    %46 = vector.broadcast %45 : vector<1x1xf32> to vector<1x128xf32>
    %47 = arith.addf %44, %46 : vector<1x128xf32>
    %c0_35 = arith.constant 0 : index
    %c0_36 = arith.constant 0 : index
    %48 = vector.load %arg14[%c0_35, %c0_36] : memref<1x128xf32, #tpu.memory_space<vmem>>, vector<1x128xf32>
    tpu.vector_store %arg14[%c0_35, %c0_36], %47 {strides = array<i32>} : memref<1x128xf32, #tpu.memory_space<vmem>>, vector<1x128xf32>,
    return
  }
  func.func @transform_0(%arg0: i32) -> (i32, i32) {
    %c0_i32 = arith.constant 0 : i32
    %c0_i32_0 = arith.constant 0 : i32
    return %arg0, %c0_i32 : i32, i32
  }
  func.func @transform_1(%arg0: i32) -> (i32, i32) {
    %c0_i32 = arith.constant 0 : i32
    %c0_i32_0 = arith.constant 0 : i32
    %c0_i32_1 = arith.constant 0 : i32
    return %c0_i32, %c0_i32_0 : i32, i32
  }
  func.func @transform_2(%arg0: i32) -> (i32, i32) {
    %c0_i32 = arith.constant 0 : i32
    %c0_i32_0 = arith.constant 0 : i32
    %c0_i32_1 = arith.constant 0 : i32
    return %c0_i32, %c0_i32_0 : i32, i32
  }
  func.func @transform_3(%arg0: i32) -> (i32, i32) {
    %c0_i32 = arith.constant 0 : i32
    %c0_i32_0 = arith.constant 0 : i32
    %c0_i32_1 = arith.constant 0 : i32
    return %c0_i32, %c0_i32_0 : i32, i32
  }
  func.func @transform_4(%arg0: i32) -> (i32, i32) {
    %c0_i32 = arith.constant 0 : i32
    %c0_i32_0 = arith.constant 0 : i32
    %c0_i32_1 = arith.constant 0 : i32
    return %c0_i32, %c0_i32_0 : i32, i32
  }
  func.func @transform_5(%arg0: i32) -> (i32, i32) {
    %c0_i32 = arith.constant 0 : i32
    %c0_i32_0 = arith.constant 0 : i32
    %c0_i32_1 = arith.constant 0 : i32
    return %c0_i32, %c0_i32_0 : i32, i32
  }
  func.func @transform_6(%arg0: i32) -> (i32, i32) {
    %c0_i32 = arith.constant 0 : i32
    %c0_i32_0 = arith.constant 0 : i32
    %c0_i32_1 = arith.constant 0 : i32
    return %c0_i32, %c0_i32_0 : i32, i32
  }
  func.func @transform_7(%arg0: i32) -> (i32, i32) {
    %c0_i32 = arith.constant 0 : i32
    %c0_i32_0 = arith.constant 0 : i32
    %c0_i32_1 = arith.constant 0 : i32
    return %c0_i32, %c0_i32_0 : i32, i32
  }
  func.func @transform_8(%arg0: i32) -> (i32, i32) {
    %c0_i32 = arith.constant 0 : i32
    %c0_i32_0 = arith.constant 0 : i32
    %c0_i32_1 = arith.constant 0 : i32
    return %c0_i32, %c0_i32_0 : i32, i32
  }
  func.func @transform_9(%arg0: i32) -> (i32, i32) {
    %c0_i32 = arith.constant 0 : i32
    %c0_i32_0 = arith.constant 0 : i32
    %c0_i32_1 = arith.constant 0 : i32
    return %c0_i32, %c0_i32_0 : i32, i32
  }
  func.func @transform_10(%arg0: i32) -> (i32, i32) {
    %c0_i32 = arith.constant 0 : i32
    %c0_i32_0 = arith.constant 0 : i32
    %c0_i32_1 = arith.constant 0 : i32
    return %c0_i32, %c0_i32_0 : i32, i32
  }
  func.func @transform_11(%arg0: i32) -> (i32, i32) {
    %c0_i32 = arith.constant 0 : i32
    %c0_i32_0 = arith.constant 0 : i32
    %c0_i32_1 = arith.constant 0 : i32
    return %c0_i32, %c0_i32_0 : i32, i32
  }
  func.func @transform_12(%arg0: i32) -> (i32, i32) {
    %c0_i32 = arith.constant 0 : i32
    %c0_i32_0 = arith.constant 0 : i32
    %c0_i32_1 = arith.constant 0 : i32
    return %c0_i32, %c0_i32_0 : i32, i32
  }
  func.func @transform_13(%arg0: i32) -> (i32, i32) {
    %c0_i32 = arith.constant 0 : i32
    %c0_i32_0 = arith.constant 0 : i32
    return %c0_i32, %arg0 : i32, i32
  }
}

</mosaic_0001>

<bundles_post_ra>
// kernel: squeeze.1
= control target key start
LH: loop header
LB: loop body
LE: loop exit
PB: predicated region body
PF: predicated region fallthrough
CT: control target
= control target key end

     0   :  { %s85_s0 = inlined_call_operand.vmem [shape: f32[16], index: 0, kind: input, shape index: {}]   ;;  %s86_s1 = inlined_call_operand.hbm [shape: f32[2,8], index: 1, kind: output, shape index: {}]  }
   0x1   :  { %v5_v0 = vld [vmem:[%s85_s0] sm:$0x1] }
   0x2   :  { %2 = vsyncpa [#allocation1], 0  ;;  %6 = vst [vmem:[#allocation3] sm:$0x1] %v5_v0  ;;  %vm8_vm0 = vcmask 64512   ;;  %s58_s0 = smov 120  }
   0x3   :  { %s59_s8 = smov [#allocation0]  }
   0x4   :  { %s26_s9 = sshll.u32 %s59_s8, 4  ;;  %s27_s9 = int_to_ptr.vmem [resolvable:$true] %s26_s9 }
   0x5   :  { %s34_s10 = scalar_lea.vmem %s27_s9, 32  ;;  %p39_p1 = scmp.lt.s32.totalorder %s27_s9, %s27_s9 }
   0x6   :  { %p35_p0 = scmp.ne.s32.totalorder %s27_s9, %s34_s10  ;;  %p40_p2 = scmp.lt.s32.totalorder %s34_s10, %s34_s10 }
   0x8   :  { %p41_p3 = por %p40_p2, %p39_p1 }
   0x9   :  { %v10_v1 = vld [vmem:[#allocation3] sm:$0x1]  }
   0xa   :  { %v7_v2 = vld [vmem:[#allocation3] sm:$0x1]   ;;  %11 = vrot.lane.b32.xlu0 %v10_v1, %s58_s0  ;;  %p42_p4 = pnand %p41_p3, %p35_p0 }
   0xb   :  { %9 = vst.msk [vmem:[#allocation2] sm:$0x1] %vm8_vm0, %v7_v2  }
  0x7c   :  { %v12_v3 = vpop.permute.xlu0 %11  }
  0x7d   :  { %15 = vst.msk [vmem:[#allocation2 + $0x1] sm:$0x1] %vm8_vm0, %v12_v3  }
  0x84   :  { %v19_v4 = vld [vmem:[#allocation2] sm:$0x3] }
  0x85   :  { %21 = vst [vmem:[#allocation0] sm:$0x3] %v19_v4 }
  0x86   :  { %45 = shalt.err (!%p42_p4)
}
  0x87   :  { %s46_s13 = scalar_lea.hbm %s86_s1, 32 }
  0x88   :  { %p47_p5 = scmp.ne.s32.totalorder %s86_s1, %s46_s13  ;;  %p50_p6 = scmp.lt.u32.totalorder %s46_s13, %s86_s1 }
  0x8a   :  { %p52_p7 = pnand %p50_p6, %p47_p5 }
  0x8c   :  { %55 = shalt.err (!%p52_p7)
}
  0x8d   :  { %29 = dma.vmem_to_hbm [thread:$0]  %s27_s9, 32, %s86_s1, [#allocation1]  }
  0x8e   :  { %56 = dma.done.wait [#allocation1], 32  }
  0x8f   :  { %57 = vsyncadd [#allocation1], 4294967264 }
  0x90   :  { %31 = vsyncpa [#allocation1], 1 }

// kernel: decoder_forward.1
= control target key start
LH: loop header
LB: loop body
LE: loop exit
PB: predicated region body
PF: predicated region fallthrough
CT: control target
= control target key end

     0   :  { %vm141_vm0 = vcmask 130048   ;;  %v810_v1 = vmov 0   ;;  %vm265_vm1 = vcmask 261120   ;;  %s1039_s0 = inlined_call_operand.vmem [shape: bf16[128,16], index: 0, kind: input, shape index: {}]   ;;  %s1040_s12 = inlined_call_operand.<no memory space> [shape: f32[1,1], index: 12, kind: input, shape index: {}]   ;;  %s1041_s1 = inlined_call_operand.vmem [shape: bf16[32,16], index: 1, kind: input, shape index: {}]   ;;  %s1042_s2 = inlined_call_operand.vmem [shape: f32[32,1], index: 2, kind: input, shape index: {}]   ;;  %s1043_s4 = inlined_call_operand.vmem [shape: f32[32,1], index: 4, kind: input, shape index: {}]   ;;  %s1044_s6 = inlined_call_operand.vmem [shape: f32[32,1], index: 6, kind: input, shape index: {}]   ;;  %s1045_s8 = inlined_call_operand.vmem [shape: f32[32,1], index: 8, kind: input, shape index: {}]   ;;  %s1046_s10 = inlined_call_operand.vmem [shape: f32[32,1], index: 10, kind: input, shape index: {}]   ;;  %s1047_s11 = inlined_call_operand.vmem [shape: f32[32,1], index: 11, kind: input, shape index: {}]   ;;  %s1048_s3 = inlined_call_operand.vmem [shape: bf16[32,32], index: 3, kind: input, shape index: {}]   ;;  %s1049_s5 = inlined_call_operand.vmem [shape: bf16[32,32], index: 5, kind: input, shape index: {}]   ;;  %s1050_s7 = inlined_call_operand.vmem [shape: bf16[32,32], index: 7, kind: input, shape index: {}]   ;;  %s1051_s9 = inlined_call_operand.vmem [shape: bf16[32,32], index: 9, kind: input, shape index: {}]   ;;  %s1052_s13 = inlined_call_operand.vmem [shape: f32[1,128], index: 13, kind: output, shape index: {}]  }
   0x1   :  { %v792_v0 = vld [vmem:[%s1039_s0] sm:$0xff]   ;;  %790 = vset.pattern.permute.xlu0 %v810_v1  ;;  %791 = vset.pattern.permute.xlu1 %v810_v1  ;;  %v18_v2 = vstv %s1040_s12  ;;  %v793_v3 = vld [vmem:[%s1039_s0 + $0x8] sm:$0xff]   ;;  %v794_v5 = vld [vmem:[%s1039_s0 + $0x10] sm:$0xff]  }
   0x2   :  { %19 = vst [vmem:[#allocation2] sm:$0x1] %v18_v2  ;;  %781 = vmatprep.subr.msk.bf16.mxu0 %vm141_vm0, %v792_v0  ;;  %v149_v4 = vsel %vm141_vm0, %v792_v0, 0  ;;  %v152_v6 = vsel %vm141_vm0, %v793_v3, 0  ;;  %v800_v7 = vld [vmem:[%s1041_s1] sm:$0xff]   ;;  %v69_v9 = vld [vmem:[%s1042_s2 + $0x10] sm:$0xff] }
   0x3   :  { %730 = vmatpush3.bf16.xpose.msra.mxu0 %v149_v4  ;;  %745 = vmatprep.mubr.msk.bf16.mxu0 %vm141_vm0, %v800_v7  ;;  %v67_v8 = vld [vmem:[%s1042_s2] sm:$0xff]  ;;  %v68_v10 = vld [vmem:[%s1042_s2 + $0x8] sm:$0xff]  ;;  %v70_v11 = vld [vmem:[%s1042_s2 + $0x18] sm:$0xff]  ;;  %v155_v12 = vsel %vm141_vm0, %v794_v5, 0 }
   0x4   :  { %782 = vmatprep.subr.msk.bf16.mxu0 %vm141_vm0, %v793_v3  ;;  %73 = vperm.xlu0 %790, %v67_v8   ;;  %v795_v13 = vld [vmem:[%s1039_s0 + $0x18] sm:$0xff]   ;;  %v231_v14 = vld [vmem:[%s1043_s4] sm:$0xff]  ;;  %v232_v15 = vld [vmem:[%s1043_s4 + $0x8] sm:$0xff] }
   0x5   :  { %83 = vperm.xlu1 %791, %v69_v9   ;;  %v233_v16 = vld [vmem:[%s1043_s4 + $0x10] sm:$0xff]  ;;  %v234_v17 = vld [vmem:[%s1043_s4 + $0x18] sm:$0xff]  ;;  %v158_v18 = vsel %vm141_vm0, %v795_v13, 0  ;;  %v796_v19 = vld [vmem:[%s1039_s0 + $0x20] sm:$0xff]  }
   0x6   :  { %v331_v20 = vld [vmem:[%s1044_s6] sm:$0xff]  ;;  %v332_v21 = vld [vmem:[%s1044_s6 + $0x8] sm:$0xff]  ;;  %v333_v22 = vld [vmem:[%s1044_s6 + $0x10] sm:$0xff]  ;;  %v161_v24 = vsel %vm141_vm0, %v796_v19, 0 }
   0x7   :  { %v334_v23 = vld [vmem:[%s1044_s6 + $0x18] sm:$0xff]  ;;  %v797_v25 = vld [vmem:[%s1039_s0 + $0x28] sm:$0xff]   ;;  %v430_v26 = vld [vmem:[%s1045_s8] sm:$0xff] }
   0x8   :  { %78 = vperm.xlu0 %790, %v68_v10   ;;  %v431_v27 = vld [vmem:[%s1045_s8 + $0x8] sm:$0xff]  ;;  %v432_v28 = vld [vmem:[%s1045_s8 + $0x10] sm:$0xff]  ;;  %v433_v29 = vld [vmem:[%s1045_s8 + $0x18] sm:$0xff]  ;;  %v164_v30 = vsel %vm141_vm0, %v797_v25, 0 }
   0x9   :  { %88 = vperm.xlu1 %791, %v70_v11   ;;  %v798_v31 = vld [vmem:[%s1039_s0 + $0x30] sm:$0xff]   ;;  %v529_v32 = vld [vmem:[%s1046_s10] sm:$0xff]  ;;  %v530_v33 = vld [vmem:[%s1046_s10 + $0x8] sm:$0xff] }
   0xa   :  { %v531_v34 = vld [vmem:[%s1046_s10 + $0x10] sm:$0xff]  ;;  %v532_v35 = vld [vmem:[%s1046_s10 + $0x18] sm:$0xff]  ;;  %v167_v36 = vsel %vm141_vm0, %v798_v31, 0  ;;  %v622_v38 = vld [vmem:[%s1047_s11] sm:$0xff] }
   0xb   :  { %732 = vmatpush3.bf16.xpose.msra.mxu0 %v152_v6  ;;  %v799_v37 = vld [vmem:[%s1039_s0 + $0x38] sm:$0xff]   ;;  %v623_v39 = vld [vmem:[%s1047_s11 + $0x8] sm:$0xff]  ;;  %v624_v40 = vld [vmem:[%s1047_s11 + $0x10] sm:$0xff] }
   0xc   :  { %783 = vmatprep.subr.msk.bf16.mxu0 %vm141_vm0, %v794_v5  ;;  %237 = vperm.xlu0 %790, %v231_v14   ;;  %v625_v41 = vld [vmem:[%s1047_s11 + $0x18] sm:$0xff]  ;;  %v170_v42 = vsel %vm141_vm0, %v799_v37, 0  ;;  %v659_v43 = vld [vmem:[#allocation2] sm:$0x1]  ;;  %v801_v44 = vld [vmem:[%s1041_s1 + $0x8] sm:$0xff]  }
   0xd   :  { %242 = vperm.xlu1 %791, %v232_v15   ;;  %v802_v45 = vld [vmem:[%s1048_s3] sm:$0xff]   ;;  %v803_v0 = vld [vmem:[%s1048_s3 + $0x8] sm:$0xff]  }
   0xe   :  { %753 = vmatprep.mubr.msk.bf16.mxu1 %vm265_vm1, %v802_v45  ;;  %v804_v1 = vld [vmem:[%s1049_s5] sm:$0xff]  }
  0x10   :  { %247 = vperm.xlu0 %790, %v233_v16  }
  0x11   :  { %252 = vperm.xlu1 %791, %v234_v17  }
  0x13   :  { %734 = vmatpush3.bf16.xpose.msra.mxu0 %v155_v12 }
  0x14   :  { %784 = vmatprep.subr.msk.bf16.mxu0 %vm141_vm0, %v795_v13  ;;  %337 = vperm.xlu0 %790, %v331_v20   ;;  %v805_v20 = vld [vmem:[%s1049_s5 + $0x8] sm:$0xff]  }
  0x15   :  { %342 = vperm.xlu1 %791, %v332_v21   ;;  %v806_v21 = vld [vmem:[%s1050_s7] sm:$0xff]  }
  0x18   :  { %347 = vperm.xlu0 %790, %v333_v22  }
  0x19   :  { %352 = vperm.xlu1 %791, %v334_v23  }
  0x1b   :  { %736 = vmatpush3.bf16.xpose.msra.mxu0 %v158_v18 }
  0x1c   :  { %785 = vmatprep.subr.msk.bf16.mxu0 %vm141_vm0, %v796_v19  ;;  %436 = vperm.xlu0 %790, %v430_v26  }
  0x1d   :  { %441 = vperm.xlu1 %791, %v431_v27  }
  0x20   :  { %446 = vperm.xlu0 %790, %v432_v28  }
  0x21   :  { %451 = vperm.xlu1 %791, %v433_v29  }
  0x23   :  { %738 = vmatpush3.bf16.xpose.msra.mxu0 %v161_v24 }
  0x24   :  { %786 = vmatprep.subr.msk.bf16.mxu0 %vm141_vm0, %v797_v25  ;;  %535 = vperm.xlu0 %790, %v529_v32  }
  0x25   :  { %540 = vperm.xlu1 %791, %v530_v33  }
  0x28   :  { %545 = vperm.xlu0 %790, %v531_v34  }
  0x29   :  { %550 = vperm.xlu1 %791, %v532_v35  }
  0x2b   :  { %740 = vmatpush3.bf16.xpose.msra.mxu0 %v164_v30 }
  0x2c   :  { %787 = vmatprep.subr.msk.bf16.mxu0 %vm141_vm0, %v798_v31  ;;  %628 = vperm.xlu0 %790, %v622_v38  }
  0x2d   :  { %633 = vperm.xlu1 %791, %v623_v39  }
  0x30   :  { %638 = vperm.xlu0 %790, %v624_v40   ;;  %v807_v40 = vld [vmem:[%s1050_s7 + $0x8] sm:$0xff]  }
  0x31   :  { %643 = vperm.xlu1 %791, %v625_v41   ;;  %v808_v41 = vld [vmem:[%s1051_s9] sm:$0xff]  }
  0x33   :  { %742 = vmatpush3.bf16.xpose.msra.mxu0 %v167_v36 }
  0x34   :  { %788 = vmatprep.subr.msk.bf16.mxu0 %vm141_vm0, %v799_v37  ;;  %662 = vperm.xlu0 %790, %v659_v43  }
  0x3b   :  { %744 = vmatpush3.bf16.xpose.msra.mxu0 %v170_v42 }
  0x42   :  { %746 = vmatmul.mubr.msk.bf16.vlgmr.msra.gmra.mrb[0].mxu0 %vm141_vm0, %v801_v44 }
  0x83   :  { %v74_v47 = vpop.permute.xlu0 %73 }
  0x84   :  { %v84_v46 = vpop.permute.xlu1 %83 }
  0x87   :  { %v79_v54 = vpop.permute.xlu0 %78 }
  0x88   :  { %v89_v51 = vpop.permute.xlu1 %88 }
  0x8b   :  { %v238_v2 = vpop.permute.xlu0 %237 }
  0x8c   :  { %v243_v3 = vpop.permute.xlu1 %242 }
  0x8f   :  { %v248_v4 = vpop.permute.xlu0 %247 }
  0x90   :  { %v253_v8 = vpop.permute.xlu1 %252 }
  0x93   :  { %v338_v22 = vpop.permute.xlu0 %337 }
  0x94   :  { %v343_v23 = vpop.permute.xlu1 %342 }
  0x97   :  { %v348_v24 = vpop.permute.xlu0 %347 }
  0x98   :  { %v353_v28 = vpop.permute.xlu1 %352 }
  0x9b   :  { %v437_v42 = vpop.permute.xlu0 %436 }
  0x9c   :  { %v442_v43 = vpop.permute.xlu1 %441 }
  0x9f   :  { %v447_v44 = vpop.permute.xlu0 %446 }
 0x115   :  { %v747_v48 = vpop.f32.mrb[0].mxu0 }
 0x116   :  { %v215_v49 = vadd.f32 %v747_v48, %v84_v46  ;;  %v206_v50 = vpop.f32.mrb[1].mxu0  ;;  %v452_v48 = vpop.permute.xlu1 %451 }
 0x117   :  { %v207_v52 = vadd.f32 %v206_v50, %v74_v47  ;;  %v748_v53 = vpop.f32.mrb[2].mxu0 }
 0x118   :  { %v218_v55 = vadd.f32 %v748_v53, %v89_v51  ;;  %v209_v56 = vpop.f32.mrb[3].mxu0  ;;  %v223_v58 = vmax.f32 %v215_v49, 0.0 }
 0x119   :  { %v210_v57 = vadd.f32 %v209_v56, %v79_v54  ;;  %v221_v60 = vmax.f32 %v207_v52, 0.0 }
 0x11a   :  { %v224_v59 = vmax.f32 %v218_v55, 0.0 }
 0x11b   :  { %v222_v61 = vmax.f32 %v210_v57, 0.0 }
 0x11c   :  { %v230_v62 = vpack.c.bf16 %v224_v59, %v223_v58 }
 0x11d   :  { %v229_v63 = vpack.c.bf16 %v222_v61, %v221_v60  ;;  %v809_v60 = vld [vmem:[%s1051_s9 + $0x8] sm:$0xff]   ;;  %v536_v61 = vpop.permute.xlu0 %535 }
 0x11f   :  { %749 = vmatprep.subr.bf16.mxu1 %v229_v63 }
 0x120   :  { %750 = vmatpush3.bf16.msra.mxu1 %v229_v63 }
 0x121   :  { %751 = vmatprep.subr.bf16.mxu1 %v230_v62  ;;  %v546_v63 = vpop.permute.xlu0 %545 }
 0x124   :  { %752 = vmatpush3.bf16.msra.mxu1 %v230_v62  ;;  %v541_v62 = vpop.permute.xlu1 %540 }
 0x127   :  { %754 = vmatmul.mubr.msk.bf16.vlgmr.msra.gmra.mrb[0].mxu1 %vm265_vm1, %v803_v0 }
 0x128   :  { %761 = vmatprep.mubr.msk.bf16.mxu1 %vm265_vm1, %v804_v1  ;;  %v551_v0 = vpop.permute.xlu1 %550 }
 0x1fa   :  { %v755_v5 = vpop.f32.mrb[0].mxu1 }
 0x1fb   :  { %v315_v6 = vadd.f32 %v755_v5, %v248_v4  ;;  %v306_v7 = vpop.f32.mrb[1].mxu1 }
 0x1fc   :  { %v307_v9 = vadd.f32 %v306_v7, %v238_v2  ;;  %v756_v10 = vpop.f32.mrb[2].mxu1 }
 0x1fd   :  { %v318_v11 = vadd.f32 %v756_v10, %v253_v8  ;;  %v309_v12 = vpop.f32.mrb[3].mxu1  ;;  %v323_v14 = vmax.f32 %v315_v6, 0.0  ;;  %v629_v6 = vpop.permute.xlu0 %628 }
 0x1fe   :  { %v310_v13 = vadd.f32 %v309_v12, %v243_v3  ;;  %v321_v16 = vmax.f32 %v307_v9, 0.0 }
 0x1ff   :  { %v324_v15 = vmax.f32 %v318_v11, 0.0  ;;  %v634_v11 = vpop.permute.xlu1 %633 }
 0x200   :  { %v322_v17 = vmax.f32 %v310_v13, 0.0 }
 0x201   :  { %v330_v18 = vpack.c.bf16 %v324_v15, %v323_v14 }
 0x202   :  { %v329_v19 = vpack.c.bf16 %v322_v17, %v321_v16  ;;  %v639_v17 = vpop.permute.xlu0 %638 }
 0x204   :  { %757 = vmatprep.subr.bf16.mxu1 %v329_v19 }
 0x205   :  { %758 = vmatpush3.bf16.msra.mxu1 %v329_v19 }
 0x206   :  { %759 = vmatprep.subr.bf16.mxu1 %v330_v18 }
 0x209   :  { %760 = vmatpush3.bf16.msra.mxu1 %v330_v18 }
 0x20c   :  { %762 = vmatmul.mubr.msk.bf16.vlgmr.msra.gmra.mrb[4].mxu1 %vm265_vm1, %v805_v20  ;;  %v644_v20 = vpop.permute.xlu1 %643 }
 0x20d   :  { %769 = vmatprep.mubr.msk.bf16.mxu1 %vm265_vm1, %v806_v21 }
 0x2df   :  { %v763_v25 = vpop.f32.mrb[4].mxu1 }
 0x2e0   :  { %v414_v26 = vadd.f32 %v763_v25, %v348_v24  ;;  %v405_v27 = vpop.f32.mrb[5].mxu1 }
 0x2e1   :  { %v406_v29 = vadd.f32 %v405_v27, %v338_v22  ;;  %v764_v30 = vpop.f32.mrb[6].mxu1 }
 0x2e2   :  { %v417_v31 = vadd.f32 %v764_v30, %v353_v28  ;;  %v408_v32 = vpop.f32.mrb[7].mxu1  ;;  %v422_v34 = vmax.f32 %v414_v26, 0.0 }
 0x2e3   :  { %v409_v33 = vadd.f32 %v408_v32, %v343_v23  ;;  %v420_v36 = vmax.f32 %v406_v29, 0.0  ;;  %v665_v23 = vlaneseq }
 0x2e4   :  { %v423_v35 = vmax.f32 %v417_v31, 0.0  ;;  %v663_v31 = vpop.permute.xlu0 %662 }
 0x2e5   :  { %v421_v37 = vmax.f32 %v409_v33, 0.0  ;;  %v666_v26 = vshrl.u32 %v665_v23, 7 }
 0x2e6   :  { %v429_v38 = vpack.c.bf16 %v423_v35, %v422_v34 }
 0x2e7   :  { %v428_v39 = vpack.c.bf16 %v421_v37, %v420_v36  ;;  %v667_v29 = vsub.s32 0, %v666_v26 }
 0x2e9   :  { %765 = vmatprep.subr.bf16.mxu1 %v428_v39  ;;  %v668_v33 = vrot.slane %v663_v31, %v667_v29 }
 0x2ea   :  { %766 = vmatpush3.bf16.msra.mxu1 %v428_v39 }
 0x2eb   :  { %767 = vmatprep.subr.bf16.mxu1 %v429_v38 }
 0x2ee   :  { %768 = vmatpush3.bf16.msra.mxu1 %v429_v38 }
 0x2f1   :  { %770 = vmatmul.mubr.msk.bf16.vlgmr.msra.gmra.mrb[8].mxu1 %vm265_vm1, %v807_v40 }
 0x2f2   :  { %777 = vmatprep.mubr.msk.bf16.mxu1 %vm265_vm1, %v808_v41 }
 0x3c4   :  { %v771_v45 = vpop.f32.mrb[8].mxu1 }
 0x3c5   :  { %v513_v46 = vadd.f32 %v771_v45, %v447_v44  ;;  %v504_v47 = vpop.f32.mrb[9].mxu1 }
 0x3c6   :  { %v505_v49 = vadd.f32 %v504_v47, %v437_v42  ;;  %v772_v50 = vpop.f32.mrb[10].mxu1 }
 0x3c7   :  { %v516_v51 = vadd.f32 %v772_v50, %v452_v48  ;;  %v507_v52 = vpop.f32.mrb[11].mxu1  ;;  %v521_v54 = vmax.f32 %v513_v46, 0.0 }
 0x3c8   :  { %v508_v53 = vadd.f32 %v507_v52, %v442_v43  ;;  %v519_v56 = vmax.f32 %v505_v49, 0.0 }
 0x3c9   :  { %v522_v55 = vmax.f32 %v516_v51, 0.0 }
 0x3ca   :  { %v520_v57 = vmax.f32 %v508_v53, 0.0 }
 0x3cb   :  { %v528_v58 = vpack.c.bf16 %v522_v55, %v521_v54 }
 0x3cc   :  { %v527_v59 = vpack.c.bf16 %v520_v57, %v519_v56 }
 0x3ce   :  { %773 = vmatprep.subr.bf16.mxu1 %v527_v59 }
 0x3cf   :  { %774 = vmatpush3.bf16.msra.mxu1 %v527_v59 }
 0x3d0   :  { %775 = vmatprep.subr.bf16.mxu1 %v528_v58 }
 0x3d3   :  { %776 = vmatpush3.bf16.msra.mxu1 %v528_v58 }
 0x3d6   :  { %778 = vmatmul.mubr.msk.bf16.vlgmr.msra.gmra.mrb[12].mxu1 %vm265_vm1, %v809_v60 }
 0x4a9   :  { %v779_v1 = vpop.f32.mrb[12].mxu1 }
 0x4aa   :  { %v603_v2 = vpop.f32.mrb[13].mxu1  ;;  %v612_v3 = vadd.f32 %v779_v1, %v546_v63 }
 0x4ab   :  { %v604_v4 = vadd.f32 %v603_v2, %v536_v61  ;;  %v780_v5 = vpop.f32.mrb[14].mxu1 }
 0x4ac   :  { %v606_v7 = vpop.f32.mrb[15].mxu1  ;;  %v615_v9 = vadd.f32 %v780_v5, %v551_v0  ;;  %v620_v12 = vmax.f32 %v612_v3, 0.0 }
 0x4ad   :  { %v618_v8 = vmax.f32 %v604_v4, 0.0  ;;  %v607_v10 = vadd.f32 %v606_v7, %v541_v62 }
 0x4ae   :  { %v621_v15 = vmax.f32 %v615_v9, 0.0  ;;  %v648_v18 = vmul.f32 %v639_v17, %v620_v12 }
 0x4af   :  { %v619_v13 = vmax.f32 %v607_v10, 0.0  ;;  %v646_v14 = vmul.f32 %v629_v6, %v618_v8 }
 0x4b0   :  { %v649_v21 = vmul.f32 %v644_v20, %v621_v15 }
 0x4b1   :  { %v647_v16 = vmul.f32 %v634_v11, %v619_v13 }
 0x4b3   :  { %v650_v19 = vadd.f32 %v647_v16, %v646_v14 }
 0x4b5   :  { %v651_v22 = vadd.f32 %v650_v19, %v648_v18 }
 0x4b7   :  { %v652_v24 = vadd.f32 %v651_v22, %v649_v21 }
 0x4b9   :  { %v653_v25 = vrot.slane %v652_v24, 4 }
 0x4bb   :  { %v654_v27 = vadd.f32 %v653_v25, %v652_v24 }
 0x4bd   :  { %v655_v28 = vrot.slane %v654_v27, 2 }
 0x4bf   :  { %v656_v30 = vadd.f32 %v655_v28, %v654_v27 }
 0x4c1   :  { %v657_v32 = vrot.slane %v656_v30, 1 }
 0x4c3   :  { %v658_v34 = vadd.f32 %v657_v32, %v656_v30 }
 0x4c5   :  { %v669_v35 = vadd.f32 %v668_v33, %v658_v34 }
 0x4c7   :  { %670 = vst [vmem:[%s1052_s13] sm:$0x1] %v669_v35 }

</bundles_post_ra>
